<compile_context>
chip_gen: v7x
topology: tpu7x:2x2x1
jax: 0.10.0
libtpu: 0.0.40
codegen_flags: <defaults>
</compile_context>

<pallas_src>
import functools

import numpy as np
import jax
import jax.numpy as jnp
from jax import lax
from jax.experimental import pallas as pl
from jax.experimental.pallas import tpu as pltpu


def _round_up(x, m):
    return (x + m - 1) // m * m


# ----------------------------- Pallas kernel ------------------------------ #
def _group_kernel(x_ref, m_ref, wa_ref, ba_ref, wc_ref, bc_ref, o_ref, tap_ref,
                  *, W, kh, kw, ph, pw, cp, ocp, compute_dtype):
    """One grid step = one group of lane-concatenated images.

      x_ref   : (1, Cp, L)          input activations (f32)
      m_ref   : (kh*kw, 1, L)       0/1 boundary masks per tap (f32)
      wa_ref  : (2*Cp, Cp)          fused 1x1 conv weight (compute dtype)
      ba_ref  : (2*Cp, 1)           1x1 conv bias (f32)
      wc_ref  : (2*OCp, kh*kw*Cp)   fused k*k conv weight, tap-major
      bc_ref  : (2*OCp, 1)          k*k conv bias (f32)
      o_ref   : (1, OCp, L)         output (lane-dense)
      tap_ref : (kh*kw*Cp, L) VMEM  stacked rolled+masked taps
    """
    L = x_ref.shape[-1]
    cd = compute_dtype

    # ---- conv_a: 1x1 MFM conv == one channel matmul + bias + max ----------
    x = x_ref[0]                                              # (Cp, L)
    acc_a = jnp.dot(wa_ref[...], x.astype(cd),
                    preferred_element_type=jnp.float32) + ba_ref[...]
    a = jnp.maximum(acc_a[:cp], acc_a[cp:])                   # (Cp, L) f32

    # ---- conv: k*k 'same' MFM conv, taps folded into the contraction ------
    # Stack the kh*kw shifted+masked copies of `a` on the sublane axis so the
    # whole conv is a single big-K MXU dot (K = kh*kw*Cp) instead of kh*kw
    # tiny-K dots plus kh*kw-1 full-width VPU accumulate adds.
    for i in range(kh):
        for j in range(kw):
            t = i * kw + j
            d = (i - ph) * W + (j - pw)
            if d == 0:
                tap = a                                       # centre tap
            else:
                # shifted[m] = a[(m + d) % L]; out-of-image / cross-image
                # lanes are zeroed by the precomputed boundary mask.
                tap = pltpu.roll(a, shift=(-d) % L, axis=1) * m_ref[t]
            tap_ref[t * cp:(t + 1) * cp, :] = tap.astype(cd)

    acc = jnp.dot(wc_ref[...], tap_ref[...],
                  preferred_element_type=jnp.float32) + bc_ref[...]
    o_ref[0] = jnp.maximum(acc[:ocp], acc[ocp:]).astype(o_ref.dtype)


# ------------------------------ helpers ------------------------------------ #
def _pad_mfm_params(w, b, ocp, cinp):
    """Zero-pad MFM conv params so each max-half has `ocp` output channels and
    `cinp` input channels (padding placed inside each half)."""
    two_oc, cin, kh, kw = w.shape
    oc = two_oc // 2
    w = w.reshape(2, oc, cin, kh, kw)
    w = jnp.pad(w, ((0, 0), (0, ocp - oc), (0, cinp - cin), (0, 0), (0, 0)))
    b = jnp.pad(b.reshape(2, oc), ((0, 0), (0, ocp - oc)))
    return w.reshape(2 * ocp, cinp, kh, kw), b.reshape(2 * ocp)


def _choose_batch_block(n, lane_width, per_img_bytes, vmem_budget):
    """Images per grid step: widen lanes for small feature maps while keeping
    >= 2 grid steps (v7x megacore) and staying inside the VMEM budget."""
    bg = 1
    for cand in range(2, n + 1):
        if n % cand:
            continue
        if cand * per_img_bytes > vmem_budget:
            break
        if n // cand < 2:
            break
        if bg * lane_width >= 512:          # already lane-dense enough
            break
        bg = cand
    return bg


def _boundary_masks(H, W, HWp, kh, kw, ph, pw, bg):
    """Compile-time 0/1 masks: mask[t] = 'source pixel of tap t is inside the
    image', replicated for bg lane-concatenated images."""
    flat = np.arange(HWp)
    rr, cc = flat // W, flat % W
    masks = np.zeros((kh * kw, 1, HWp), np.float32)
    for i in range(kh):
        for j in range(kw):
            dy, dx = i - ph, j - pw
            valid = ((rr + dy >= 0) & (rr + dy < H) &
                     (cc + dx >= 0) & (cc + dx < W) & (flat < H * W))
            masks[i * kw + j, 0, :] = valid
    return jnp.asarray(np.tile(masks, (1, 1, bg)))


# ------------------------------ JAX wrapper -------------------------------- #
def group_forward(x_nchw, params, *, kernel_size, stride, padding,
                  compute_dtype=jnp.float32):
    """group: conv_a = mfm(C, C, 1, 1, 0); conv = mfm(C, OC, k, s, p)."""
    N, C, H, W = x_nchw.shape
    two_c = params["conv_a_w"].shape[0]
    two_oc, _, kh, kw = params["conv_w"].shape
    OC = two_oc // 2
    assert two_c == 2 * C and kh == kernel_size and kw == kernel_size
    # Fused fast path: stride-1 'same' convs (how `group` is used in LightCNN).
    # TODO(synk): add a window-slice kernel for stride > 1 / non-'same' convs.
    assert stride == 1 and kh == 2 * padding + 1, (
        "fused Pallas path implements stride=1 'same' convs only")

    cd_bytes = jnp.dtype(compute_dtype).itemsize
    c_align = 8 * max(1, 4 // cd_bytes)         # keep compute-dtype tap slabs packed
    Cp = _round_up(C, c_align)
    OCp = _round_up(OC, 8)
    HW, HWp = H * W, _round_up(H * W, 128)
    khw = kh * kw

    # --- activations: NCHW -> (groups, Cp, lanes), zero-padded -------------
    x_flat = x_nchw.reshape(N, C, HW)
    if Cp != C or HWp != HW:
        x_flat = jnp.pad(x_flat, ((0, 0), (0, Cp - C), (0, HWp - HW)))

    per_img_bytes = HWp * (Cp * 4 * 2            # input block (double buffered)
                           + khw * Cp * cd_bytes  # tap scratch
                           + Cp * 4               # intermediate a
                           + 2 * OCp * 4          # pre-MFM accumulator
                           + OCp * 4 * 2)         # output block (double buffered)
    Bg = _choose_batch_block(N, HWp, per_img_bytes, vmem_budget=24 << 20)
    G, L = N // Bg, Bg * HWp
    if Bg > 1:   # lane-concatenate Bg images per grid step (lane-dense stores)
        x_flat = (x_flat.reshape(G, Bg, Cp, HWp)
                  .transpose(0, 2, 1, 3).reshape(G, Cp, L))

    # --- fused / padded weights --------------------------------------------
    wa, ba = _pad_mfm_params(params["conv_a_w"], params["conv_a_b"], Cp, Cp)
    wc, bc = _pad_mfm_params(params["conv_w"], params["conv_b"], OCp, Cp)
    wa_flat = wa.reshape(2 * Cp, Cp).astype(compute_dtype)
    ba_col = ba.reshape(2 * Cp, 1).astype(jnp.float32)
    # tap-major: wc_flat[o, (i*kw + j)*Cp + c] = conv_w[o, c, i, j]
    wc_flat = (wc.transpose(0, 2, 3, 1)
               .reshape(2 * OCp, khw * Cp).astype(compute_dtype))
    bc_col = bc.reshape(2 * OCp, 1).astype(jnp.float32)

    masks = _boundary_masks(H, W, HWp, kh, kw, padding, padding, Bg)

    weight_bytes = 2 * ((2 * Cp * Cp + 2 * OCp * khw * Cp) * cd_bytes
                        + (2 * Cp + 2 * OCp) * 4 + khw * L * 4)
    vmem_limit = int(min(64 << 20,               # v7x-safe cap (64 MiB / TC)
                         max(32 << 20, 2 * Bg * per_img_bytes + weight_bytes)))

    kern = functools.partial(_group_kernel, W=W, kh=kh, kw=kw,
                             ph=padding, pw=padding, cp=Cp, ocp=OCp,
                             compute_dtype=compute_dtype)
    # TODO(synk): for N == 1 on v7x, add a second parallel grid axis that
    # splits OC across the two TensorCores (recomputing the cheap 1x1 conv_a).
    out = pl.pallas_call(
        kern,
        out_shape=jax.ShapeDtypeStruct((G, OCp, L), x_nchw.dtype),
        grid=(G,),
        in_specs=[
            pl.BlockSpec((1, Cp, L), lambda g: (g, 0, 0)),          # activations
            pl.BlockSpec((khw, 1, L), lambda g: (0, 0, 0)),         # boundary masks
            pl.BlockSpec((2 * Cp, Cp), lambda g: (0, 0)),           # resident weights
            pl.BlockSpec((2 * Cp, 1), lambda g: (0, 0)),
            pl.BlockSpec((2 * OCp, khw * Cp), lambda g: (0, 0)),
            pl.BlockSpec((2 * OCp, 1), lambda g: (0, 0)),
        ],
        out_specs=pl.BlockSpec((1, OCp, L), lambda g: (g, 0, 0)),   # lane-dense
        scratch_shapes=[pltpu.VMEM((khw * Cp, L), compute_dtype)],  # stacked taps
        compiler_params=pltpu.CompilerParams(
            dimension_semantics=("parallel",),       # megacore over image groups
            vmem_limit_bytes=vmem_limit),
    )(x_flat, masks, wa_flat, ba_col, wc_flat, bc_col)

    # --- back to NCHW, drop channel / spatial padding -----------------------
    if Bg > 1:
        out = (out.reshape(G, OCp, Bg, HWp)
               .transpose(0, 2, 1, 3).reshape(N, OCp, HWp))
    else:
        out = out.reshape(N, OCp, HWp)
    return out[:, :OC, :HW].reshape(N, OC, H, W)


# ------------------------- deterministic params ---------------------------- #
def init_group_params(key, in_channels, out_channels, kernel_size):
    k1, k2, k3, k4 = jax.random.split(key, 4)
    fan_a = in_channels * 1 * 1
    bound_a = 1.0 / (fan_a ** 0.5)
    conv_a_w = jax.random.uniform(k1, (2 * in_channels, in_channels, 1, 1),
                                  jnp.float32, -bound_a, bound_a)
    conv_a_b = jax.random.uniform(k2, (2 * in_channels,), jnp.float32,
                                  -bound_a, bound_a)
    fan_c = in_channels * kernel_size * kernel_size
    bound_c = 1.0 / (fan_c ** 0.5)
    conv_w = jax.random.uniform(
        k3, (2 * out_channels, in_channels, kernel_size, kernel_size),
        jnp.float32, -bound_c, bound_c)
    conv_b = jax.random.uniform(k4, (2 * out_channels,), jnp.float32,
                                -bound_c, bound_c)
    return {"conv_a_w": conv_a_w, "conv_a_b": conv_a_b,
            "conv_w": conv_w, "conv_b": conv_b}


# --------------------------- pure-JAX reference ---------------------------- #
def _ref_mfm(x, w, b, stride, padding, oc):
    y = lax.conv_general_dilated(
        x, w, (stride, stride), ((padding, padding), (padding, padding)),
        dimension_numbers=("NCHW", "OIHW", "NCHW"))
    y = y + b.reshape(1, -1, 1, 1)
    return jnp.maximum(y[:, :oc], y[:, oc:])


def _ref_group(x, params, kernel_size, stride, padding):
    in_ch = params["conv_a_w"].shape[1]
    out_ch = params["conv_w"].shape[0] // 2
    x = _ref_mfm(x, params["conv_a_w"], params["conv_a_b"], 1, 0, in_ch)
    x = _ref_mfm(x, params["conv_w"], params["conv_b"], stride, padding, out_ch)
    return x


# --------------------------------- main ------------------------------------ #
if __name__ == "__main__":
    key = jax.random.PRNGKey(0)
    kx, kp, kx2 = jax.random.split(key, 3)

    # Config A: batch=2, C=4, 16x16 spatial (already lane-dense, Bg=1, G=2).
    N, C_in, H, W = 2, 4, 16, 16
    C_out, K_SZ, STRIDE, PAD = 8, 3, 1, 1
    x = jax.random.normal(kx, (N, C_in, H, W), jnp.float32)      # NCHW
    params = init_group_params(kp, C_in, C_out, K_SZ)
    ref = _ref_group(x, params, K_SZ, STRIDE, PAD)

    fwd_f32 = jax.jit(functools.partial(group_forward, kernel_size=K_SZ,
                                        stride=STRIDE, padding=PAD,
                                        compute_dtype=jnp.float32))
    out = jax.block_until_ready(fwd_f32(x, params))
    assert out.shape == (N, C_out, H, W), out.shape
    assert jnp.allclose(out, ref, atol=1e-4, rtol=1e-4), "f32 mismatch vs ref"

    # bf16 MXU-operand fast path (v6e/v7x); accumulation / bias / max stay f32.
    fwd_bf16 = jax.jit(functools.partial(group_forward, kernel_size=K_SZ,
                                         stride=STRIDE, padding=PAD,
                                         compute_dtype=jnp.bfloat16))
    out16 = jax.block_until_ready(fwd_bf16(x, params))
    assert jnp.allclose(out16, ref, atol=7.5e-2, rtol=7.5e-2), "bf16 mismatch"

    # Config B: small 8x8 feature map -> spatial padded to 128 lanes and two
    # images lane-concatenated per grid step (Bg=2), exercising those paths.
    N2, H2, W2 = 4, 8, 8
    x2 = jax.random.normal(kx2, (N2, C_in, H2, W2), jnp.float32)
    ref2 = _ref_group(x2, params, K_SZ, STRIDE, PAD)
    out2 = jax.block_until_ready(fwd_f32(x2, params))
    assert out2.shape == (N2, C_out, H2, W2), out2.shape
    assert jnp.allclose(out2, ref2, atol=1e-4, rtol=1e-4), "mismatch (config B)"

    print("KERNEL_OK")
</pallas_src>

<mosaic_0001>
module attributes {stable_mosaic.version = 11 : i64} {
  func.func @_group_kernel(%arg0: i32, %arg1: memref<1x8x256xf32, #tpu.memory_space<vmem>>, %arg2: memref<9x1x256xf32, #tpu.memory_space<vmem>>, %arg3: memref<16x8xf32, #tpu.memory_space<vmem>>, %arg4: memref<16x1xf32, #tpu.memory_space<vmem>>, %arg5: memref<16x72xf32, #tpu.memory_space<vmem>>, %arg6: memref<16x1xf32, #tpu.memory_space<vmem>>, %arg7: memref<1x8x256xf32, #tpu.memory_space<vmem>>, %arg8: memref<72x256xf32, #tpu.memory_space<vmem>>) attributes {dimension_semantics = [#tpu.dimension_semantics<parallel>], iteration_bounds = array<i64: 2>, scalar_prefetch = 0 : i64, scratch_operands = 1 : i64, tpu.core_type = #tpu.core_type<tc>, window_params = [{transform_indices = @transform_0, window_bounds = array<i64: 1, 8, 256>}, {pipeline_mode = #tpu.pipeline_mode<synchronous>, transform_indices = @transform_1, window_bounds = array<i64: 9, 1, 256>}, {pipeline_mode = #tpu.pipeline_mode<synchronous>, transform_indices = @transform_2, window_bounds = array<i64: 16, 8>}, {pipeline_mode = #tpu.pipeline_mode<synchronous>, transform_indices = @transform_3, window_bounds = array<i64: 16, 1>}, {pipeline_mode = #tpu.pipeline_mode<synchronous>, transform_indices = @transform_4, window_bounds = array<i64: 16, 72>}, {pipeline_mode = #tpu.pipeline_mode<synchronous>, transform_indices = @transform_5, window_bounds = array<i64: 16, 1>}, {transform_indices = @transform_6, window_bounds = array<i64: 1, 8, 256>}]} {
    %c0 = arith.constant 0 : index
    %c0_0 = arith.constant 0 : index
    %c0_1 = arith.constant 0 : index
    %0 = vector.load %arg1[%c0, %c0_0, %c0_1] : memref<1x8x256xf32, #tpu.memory_space<vmem>>, vector<1x8x256xf32>
    %1 = vector.shape_cast %0 : vector<1x8x256xf32> to vector<8x256xf32>
    %c0_2 = arith.constant 0 : index
    %c0_3 = arith.constant 0 : index
    %2 = vector.load %arg3[%c0_2, %c0_3] : memref<16x8xf32, #tpu.memory_space<vmem>>, vector<16x8xf32>
    %cst = arith.constant dense<0.000000e+00> : vector<16x256xf32>
    %3 = tpu.matmul %2, %1, %cst {dimension_numbers = #tpu.dot_dimension_numbers<[1], [0], [0], [1], [0, 0, 1, 1], [], []>} : vector<16x8xf32>, vector<8x256xf32>, vector<16x256xf32> -> vector<16x256xf32>
    %c0_4 = arith.constant 0 : index
    %c0_5 = arith.constant 0 : index
    %4 = vector.load %arg4[%c0_4, %c0_5] : memref<16x1xf32, #tpu.memory_space<vmem>>, vector<16x1xf32>
    %5 = vector.broadcast %4 : vector<16x1xf32> to vector<16x256xf32>
    %6 = arith.addf %3, %5 : vector<16x256xf32>
    %7 = vector.extract_strided_slice %6 {offsets = [0, 0], sizes = [8, 256], strides = [1, 1]} : vector<16x256xf32> to vector<8x256xf32>
    %8 = vector.extract_strided_slice %6 {offsets = [8, 0], sizes = [8, 256], strides = [1, 1]} : vector<16x256xf32> to vector<8x256xf32>
    %9 = arith.maximumf %7, %8 : vector<8x256xf32>
    %c17_i32 = arith.constant 17 : i32
    %10 = tpu.dynamic_rotate %9 by %c17_i32 dim 1 : vector<8x256xf32>, i32 -> vector<8x256xf32>
    %c0_6 = arith.constant 0 : index
    %c0_7 = arith.constant 0 : index
    %c0_8 = arith.constant 0 : index
    %11 = vector.load %arg2[%c0_6, %c0_7, %c0_8] : memref<9x1x256xf32, #tpu.memory_space<vmem>>, vector<1x1x256xf32>
    %12 = vector.shape_cast %11 : vector<1x1x256xf32> to vector<1x256xf32>
    %13 = vector.broadcast %12 : vector<1x256xf32> to vector<8x256xf32>
    %14 = arith.mulf %10, %13 : vector<8x256xf32>
    %c0_9 = arith.constant 0 : index
    %c0_10 = arith.constant 0 : index
    %15 = vector.load %arg8[%c0_9, %c0_10] : memref<72x256xf32, #tpu.memory_space<vmem>>, vector<8x256xf32>
    tpu.vector_store %arg8[%c0_9, %c0_10], %14 {strides = array<i32>} : memref<72x256xf32, #tpu.memory_space<vmem>>, vector<8x256xf32>,
    %c16_i32 = arith.constant 16 : i32
    %16 = tpu.dynamic_rotate %9 by %c16_i32 dim 1 : vector<8x256xf32>, i32 -> vector<8x256xf32>
    %c1 = arith.constant 1 : index
    %c0_11 = arith.constant 0 : index
    %c0_12 = arith.constant 0 : index
    %17 = vector.load %arg2[%c1, %c0_11, %c0_12] : memref<9x1x256xf32, #tpu.memory_space<vmem>>, vector<1x1x256xf32>
    %18 = vector.shape_cast %17 : vector<1x1x256xf32> to vector<1x256xf32>
    %19 = vector.broadcast %18 : vector<1x256xf32> to vector<8x256xf32>
    %20 = arith.mulf %16, %19 : vector<8x256xf32>
    %c8 = arith.constant 8 : index
    %c0_13 = arith.constant 0 : index
    %21 = vector.load %arg8[%c8, %c0_13] : memref<72x256xf32, #tpu.memory_space<vmem>>, vector<8x256xf32>
    tpu.vector_store %arg8[%c8, %c0_13], %20 {strides = array<i32>} : memref<72x256xf32, #tpu.memory_space<vmem>>, vector<8x256xf32>,
    %c15_i32 = arith.constant 15 : i32
    %22 = tpu.dynamic_rotate %9 by %c15_i32 dim 1 : vector<8x256xf32>, i32 -> vector<8x256xf32>
    %c2 = arith.constant 2 : index
    %c0_14 = arith.constant 0 : index
    %c0_15 = arith.constant 0 : index
    %23 = vector.load %arg2[%c2, %c0_14, %c0_15] : memref<9x1x256xf32, #tpu.memory_space<vmem>>, vector<1x1x256xf32>
    %24 = vector.shape_cast %23 : vector<1x1x256xf32> to vector<1x256xf32>
    %25 = vector.broadcast %24 : vector<1x256xf32> to vector<8x256xf32>
    %26 = arith.mulf %22, %25 : vector<8x256xf32>
    %c16 = arith.constant 16 : index
    %c0_16 = arith.constant 0 : index
    %27 = vector.load %arg8[%c16, %c0_16] : memref<72x256xf32, #tpu.memory_space<vmem>>, vector<8x256xf32>
    tpu.vector_store %arg8[%c16, %c0_16], %26 {strides = array<i32>} : memref<72x256xf32, #tpu.memory_space<vmem>>, vector<8x256xf32>,
    %c1_i32 = arith.constant 1 : i32
    %28 = tpu.dynamic_rotate %9 by %c1_i32 dim 1 : vector<8x256xf32>, i32 -> vector<8x256xf32>
    %c3 = arith.constant 3 : index
    %c0_17 = arith.constant 0 : index
    %c0_18 = arith.constant 0 : index
    %29 = vector.load %arg2[%c3, %c0_17, %c0_18] : memref<9x1x256xf32, #tpu.memory_space<vmem>>, vector<1x1x256xf32>
    %30 = vector.shape_cast %29 : vector<1x1x256xf32> to vector<1x256xf32>
    %31 = vector.broadcast %30 : vector<1x256xf32> to vector<8x256xf32>
    %32 = arith.mulf %28, %31 : vector<8x256xf32>
    %c24 = arith.constant 24 : index
    %c0_19 = arith.constant 0 : index
    %33 = vector.load %arg8[%c24, %c0_19] : memref<72x256xf32, #tpu.memory_space<vmem>>, vector<8x256xf32>
    tpu.vector_store %arg8[%c24, %c0_19], %32 {strides = array<i32>} : memref<72x256xf32, #tpu.memory_space<vmem>>, vector<8x256xf32>,
    %c32 = arith.constant 32 : index
    %c0_20 = arith.constant 0 : index
    %34 = vector.load %arg8[%c32, %c0_20] : memref<72x256xf32, #tpu.memory_space<vmem>>, vector<8x256xf32>
    tpu.vector_store %arg8[%c32, %c0_20], %9 {strides = array<i32>} : memref<72x256xf32, #tpu.memory_space<vmem>>, vector<8x256xf32>,
    %c255_i32 = arith.constant 255 : i32
    %35 = tpu.dynamic_rotate %9 by %c255_i32 dim 1 : vector<8x256xf32>, i32 -> vector<8x256xf32>
    %c5 = arith.constant 5 : index
    %c0_21 = arith.constant 0 : index
    %c0_22 = arith.constant 0 : index
    %36 = vector.load %arg2[%c5, %c0_21, %c0_22] : memref<9x1x256xf32, #tpu.memory_space<vmem>>, vector<1x1x256xf32>
    %37 = vector.shape_cast %36 : vector<1x1x256xf32> to vector<1x256xf32>
    %38 = vector.broadcast %37 : vector<1x256xf32> to vector<8x256xf32>
    %39 = arith.mulf %35, %38 : vector<8x256xf32>
    %c40 = arith.constant 40 : index
    %c0_23 = arith.constant 0 : index
    %40 = vector.load %arg8[%c40, %c0_23] : memref<72x256xf32, #tpu.memory_space<vmem>>, vector<8x256xf32>
    tpu.vector_store %arg8[%c40, %c0_23], %39 {strides = array<i32>} : memref<72x256xf32, #tpu.memory_space<vmem>>, vector<8x256xf32>,
    %c241_i32 = arith.constant 241 : i32
    %41 = tpu.dynamic_rotate %9 by %c241_i32 dim 1 : vector<8x256xf32>, i32 -> vector<8x256xf32>
    %c6 = arith.constant 6 : index
    %c0_24 = arith.constant 0 : index
    %c0_25 = arith.constant 0 : index
    %42 = vector.load %arg2[%c6, %c0_24, %c0_25] : memref<9x1x256xf32, #tpu.memory_space<vmem>>, vector<1x1x256xf32>
    %43 = vector.shape_cast %42 : vector<1x1x256xf32> to vector<1x256xf32>
    %44 = vector.broadcast %43 : vector<1x256xf32> to vector<8x256xf32>
    %45 = arith.mulf %41, %44 : vector<8x256xf32>
    %c48 = arith.constant 48 : index
    %c0_26 = arith.constant 0 : index
    %46 = vector.load %arg8[%c48, %c0_26] : memref<72x256xf32, #tpu.memory_space<vmem>>, vector<8x256xf32>
    tpu.vector_store %arg8[%c48, %c0_26], %45 {strides = array<i32>} : memref<72x256xf32, #tpu.memory_space<vmem>>, vector<8x256xf32>,
    %c240_i32 = arith.constant 240 : i32
    %47 = tpu.dynamic_rotate %9 by %c240_i32 dim 1 : vector<8x256xf32>, i32 -> vector<8x256xf32>
    %c7 = arith.constant 7 : index
    %c0_27 = arith.constant 0 : index
    %c0_28 = arith.constant 0 : index
    %48 = vector.load %arg2[%c7, %c0_27, %c0_28] : memref<9x1x256xf32, #tpu.memory_space<vmem>>, vector<1x1x256xf32>
    %49 = vector.shape_cast %48 : vector<1x1x256xf32> to vector<1x256xf32>
    %50 = vector.broadcast %49 : vector<1x256xf32> to vector<8x256xf32>
    %51 = arith.mulf %47, %50 : vector<8x256xf32>
    %c56 = arith.constant 56 : index
    %c0_29 = arith.constant 0 : index
    %52 = vector.load %arg8[%c56, %c0_29] : memref<72x256xf32, #tpu.memory_space<vmem>>, vector<8x256xf32>
    tpu.vector_store %arg8[%c56, %c0_29], %51 {strides = array<i32>} : memref<72x256xf32, #tpu.memory_space<vmem>>, vector<8x256xf32>,
    %c239_i32 = arith.constant 239 : i32
    %53 = tpu.dynamic_rotate %9 by %c239_i32 dim 1 : vector<8x256xf32>, i32 -> vector<8x256xf32>
    %c8_30 = arith.constant 8 : index
    %c0_31 = arith.constant 0 : index
    %c0_32 = arith.constant 0 : index
    %54 = vector.load %arg2[%c8_30, %c0_31, %c0_32] : memref<9x1x256xf32, #tpu.memory_space<vmem>>, vector<1x1x256xf32>
    %55 = vector.shape_cast %54 : vector<1x1x256xf32> to vector<1x256xf32>
    %56 = vector.broadcast %55 : vector<1x256xf32> to vector<8x256xf32>
    %57 = arith.mulf %53, %56 : vector<8x256xf32>
    %c64 = arith.constant 64 : index
    %c0_33 = arith.constant 0 : index
    %58 = vector.load %arg8[%c64, %c0_33] : memref<72x256xf32, #tpu.memory_space<vmem>>, vector<8x256xf32>
    tpu.vector_store %arg8[%c64, %c0_33], %57 {strides = array<i32>} : memref<72x256xf32, #tpu.memory_space<vmem>>, vector<8x256xf32>,
    %c0_34 = arith.constant 0 : index
    %c0_35 = arith.constant 0 : index
    %59 = vector.load %arg5[%c0_34, %c0_35] : memref<16x72xf32, #tpu.memory_space<vmem>>, vector<16x72xf32>
    %c0_36 = arith.constant 0 : index
    %c0_37 = arith.constant 0 : index
    %60 = vector.load %arg8[%c0_36, %c0_37] : memref<72x256xf32, #tpu.memory_space<vmem>>, vector<72x256xf32>
    %cst_38 = arith.constant dense<0.000000e+00> : vector<16x256xf32>
    %61 = tpu.matmul %59, %60, %cst_38 {dimension_numbers = #tpu.dot_dimension_numbers<[1], [0], [0], [1], [0, 0, 1, 1], [], []>} : vector<16x72xf32>, vector<72x256xf32>, vector<16x256xf32> -> vector<16x256xf32>
    %c0_39 = arith.constant 0 : index
    %c0_40 = arith.constant 0 : index
    %62 = vector.load %arg6[%c0_39, %c0_40] : memref<16x1xf32, #tpu.memory_space<vmem>>, vector<16x1xf32>
    %63 = vector.broadcast %62 : vector<16x1xf32> to vector<16x256xf32>
    %64 = arith.addf %61, %63 : vector<16x256xf32>
    %65 = vector.extract_strided_slice %64 {offsets = [0, 0], sizes = [8, 256], strides = [1, 1]} : vector<16x256xf32> to vector<8x256xf32>
    %66 = vector.extract_strided_slice %64 {offsets = [8, 0], sizes = [8, 256], strides = [1, 1]} : vector<16x256xf32> to vector<8x256xf32>
    %67 = arith.maximumf %65, %66 : vector<8x256xf32>
    %c0_41 = arith.constant 0 : index
    %c0_42 = arith.constant 0 : index
    %c0_43 = arith.constant 0 : index
    %68 = vector.load %arg7[%c0_41, %c0_42, %c0_43] : memref<1x8x256xf32, #tpu.memory_space<vmem>>, vector<1x8x256xf32>
    %69 = vector.shape_cast %68 : vector<1x8x256xf32> to vector<8x256xf32>
    %70 = vector.shape_cast %67 : vector<8x256xf32> to vector<1x8x256xf32>
    tpu.vector_store %arg7[%c0_41, %c0_42, %c0_43], %70 {strides = array<i32>} : memref<1x8x256xf32, #tpu.memory_space<vmem>>, vector<1x8x256xf32>,
    return
  }
  func.func @transform_0(%arg0: i32) -> (i32, i32, i32) {
    %c0_i32 = arith.constant 0 : i32
    %c0_i32_0 = arith.constant 0 : i32
    %c0_i32_1 = arith.constant 0 : i32
    return %arg0, %c0_i32, %c0_i32_0 : i32, i32, i32
  }
  func.func @transform_1(%arg0: i32) -> (i32, i32, i32) {
    %c0_i32 = arith.constant 0 : i32
    %c0_i32_0 = arith.constant 0 : i32
    %c0_i32_1 = arith.constant 0 : i32
    %c0_i32_2 = arith.constant 0 : i32
    return %c0_i32, %c0_i32_0, %c0_i32_1 : i32, i32, i32
  }
  func.func @transform_2(%arg0: i32) -> (i32, i32) {
    %c0_i32 = arith.constant 0 : i32
    %c0_i32_0 = arith.constant 0 : i32
    %c0_i32_1 = arith.constant 0 : i32
    return %c0_i32, %c0_i32_0 : i32, i32
  }
  func.func @transform_3(%arg0: i32) -> (i32, i32) {
    %c0_i32 = arith.constant 0 : i32
    %c0_i32_0 = arith.constant 0 : i32
    %c0_i32_1 = arith.constant 0 : i32
    return %c0_i32, %c0_i32_0 : i32, i32
  }
  func.func @transform_4(%arg0: i32) -> (i32, i32) {
    %c0_i32 = arith.constant 0 : i32
    %c0_i32_0 = arith.constant 0 : i32
    %c0_i32_1 = arith.constant 0 : i32
    return %c0_i32, %c0_i32_0 : i32, i32
  }
  func.func @transform_5(%arg0: i32) -> (i32, i32) {
    %c0_i32 = arith.constant 0 : i32
    %c0_i32_0 = arith.constant 0 : i32
    %c0_i32_1 = arith.constant 0 : i32
    return %c0_i32, %c0_i32_0 : i32, i32
  }
  func.func @transform_6(%arg0: i32) -> (i32, i32, i32) {
    %c0_i32 = arith.constant 0 : i32
    %c0_i32_0 = arith.constant 0 : i32
    %c0_i32_1 = arith.constant 0 : i32
    return %arg0, %c0_i32, %c0_i32_0 : i32, i32, i32
  }
}

</mosaic_0001>

<bundles_post_ra>
// kernel: group_forward.1
= control target key start
LH: loop header
LB: loop body
LE: loop exit
PB: predicated region body
PF: predicated region fallthrough
CT: control target
= control target key end

     0   :  { %s847_s21 = smov 0   ;;  %s971_s0 = inlined_call_operand.vmem [shape: f32[2,8,256], index: 0, kind: input, shape index: {}]   ;;  %s972_s1 = inlined_call_operand.vmem [shape: f32[9,1,256], index: 1, kind: input, shape index: {}]   ;;  %s973_s2 = inlined_call_operand.vmem [shape: f32[16,8], index: 2, kind: input, shape index: {}]   ;;  %s974_s3 = inlined_call_operand.vmem [shape: f32[16,1], index: 3, kind: input, shape index: {}]   ;;  %s975_s4 = inlined_call_operand.vmem [shape: f32[16,72], index: 4, kind: input, shape index: {}]   ;;  %s976_s5 = inlined_call_operand.vmem [shape: f32[16,1], index: 5, kind: input, shape index: {}]   ;;  %s977_s6 = inlined_call_operand.vmem [shape: f32[2,8,256], index: 6, kind: output, shape index: {}]  }
   0x1 LB: > { %s724_s22 = sadd.s32 4294967295, %s800_s21   ;;  %p728_p0 = scmp.ge.s32.totalorder %s800_s21, 1  ;;  %s800_s21 = sphi %s847_s21, %s16_s21  }
   0x2   : > { %p212_p1 = scmp.lt.s32.totalorder %s800_s21, 3 }
   0x4   : > { %p213_p2 = pnand %p728_p0, %p212_p1 }
   0x5   : > { %p242_p3 = scmp.lt.s32.totalorder (!%p213_p2), %s724_s22, 1  ;;  %v802_v0 = vmov (!%p213_p2), 0.0   ;;  %v803_v1 = vmov (!%p213_p2), 0   ;;  %v256_v2 = vld [vmem:[%s974_s3] sm:$0xff] (!%p213_p2)  ;;  %v257_v3 = vld [vmem:[%s974_s3 + $0x8] sm:$0xff] (!%p213_p2)  ;;  %vm268_vm0 = vcmask (!%p213_p2), 64512   ;;  %v358_v22 = vlaneseq (!%p213_p2) }
   0x6   : > { %216 = sbr.rel (%p213_p2) target bundleno = 611 (0x263), region = 44  ;;  %339 = vmatprep.mubr.f32.mxu0 (!%p213_p2), %v802_v0  ;;  %792 = vset.pattern.permute.xlu0 (!%p213_p2), %v803_v1  ;;  %v254_v6 = vld [vmem:[%s973_s2] sm:$0xff] (!%p213_p2)  ;;  %v255_v7 = vld [vmem:[%s973_s2 + $0x8] sm:$0xff] (!%p213_p2)  ;;  %s804_s11 = smov (!%p213_p2), 16   ;;  %vm581_vm9 = vcmask (!%p213_p2), 588800  }
   0x7   : > { %260 = vperm.xlu0 (!%p213_p2), %792, %v256_v2   ;;  %658 = vmatprep.mubr.f32.mxu1 (!%p213_p2), %v802_v0  ;;  %s805_s12 = smov (!%p213_p2), 17   ;;  %s806_s13 = smov (!%p213_p2), 15   ;;  %v569_v20 = vld [vmem:[%s976_s5] sm:$0xff] (!%p213_p2)  ;;  %v570_v21 = vld [vmem:[%s976_s5 + $0x8] sm:$0xff] (!%p213_p2)  ;;  %v366_v23 = vshrl.u32 (!%p213_p2), %v358_v22, 7  ;;  %v901_v26 = vand.u32 (!%p213_p2), 127, %v358_v22 }
   0x8   : > { %793 = vset.pattern.permute.xlu1 (!%p213_p2), %v803_v1  ;;  %s807_s14 = smov (!%p213_p2), 1   ;;  %s808_s15 = smov (!%p213_p2), 127   ;;  %v363_v28 = vld [vmem:[%s972_s1] sm:$0x3] (!%p213_p2)  ;;  %v735_v30 = vld [vmem:[%s972_s1 + $0x2] sm:$0x3] (!%p213_p2) }
   0x9   : > { %s809_s16 = smov (!%p213_p2), 113   ;;  %s810_s17 = smov (!%p213_p2), 112   ;;  %v903_v27 = vsub.s32 (!%p213_p2), 0, %v366_v23  ;;  %v908_v29 = vsub.s32 (!%p213_p2), 1, %v366_v23  ;;  %vm360_vm1 = vcmp.lt.s32.totalorder (!%p213_p2), %v901_v26, 17  ;;  %vm383_vm2 = vcmp.lt.s32.totalorder (!%p213_p2), %v901_v26, 16 }
   0xa   : > { %s811_s18 = smov (!%p213_p2), 111   ;;  %v736_v47 = vld [vmem:[%s972_s1 + $0x4] sm:$0x3] (!%p213_p2)  ;;  %v737_v48 = vld [vmem:[%s972_s1 + $0x6] sm:$0x3] (!%p213_p2)  ;;  %vm407_vm3 = vcmp.lt.s32.totalorder (!%p213_p2), %v901_v26, 15 }
   0xb   : > { %265 = vperm.xlu0 (!%p213_p2), %792, %v257_v3   ;;  %v368_v33 = vrot.slane (!%p213_p2), %v363_v28, %v903_v27  ;;  %v372_v34 = vrot.slane (!%p213_p2), %v363_v28, %v908_v29  ;;  %v392_v35 = vrot.slane (!%p213_p2), %v735_v30, %v903_v27  ;;  %v396_v36 = vrot.slane (!%p213_p2), %v735_v30, %v908_v29  ;;  %v738_v57 = vld [vmem:[%s972_s1 + $0xa] sm:$0x3] (!%p213_p2) }
   0xc   : > { %v416_v52 = vrot.slane (!%p213_p2), %v736_v47, %v903_v27  ;;  %v420_v54 = vrot.slane (!%p213_p2), %v736_v47, %v908_v29  ;;  %vm431_vm4 = vcmp.lt.s32.totalorder (!%p213_p2), %v901_v26, 1  ;;  %v440_v55 = vrot.slane (!%p213_p2), %v737_v48, %v903_v27 }
   0xd   : > { %s979_s22 = smov (!%p242_p3, %s724_s22), 1  ;;  %v444_v56 = vrot.slane %v737_v48, %v908_v29  ;;  %vm457_vm5 = vcmp.lt.s32.totalorder %v901_v26, 127  ;;  %v466_v63 = vrot.slane %v738_v57, %v903_v27  ;;  %vm481_vm6 = vcmp.lt.s32.totalorder %v901_v26, 113 }
   0xe   : > { %s746_s27 = sshll.u32 %s979_s22, 4  ;;  %vm505_vm7 = vcmp.lt.s32.totalorder %v901_v26, 112  ;;  %vm529_vm8 = vcmp.lt.s32.totalorder %v901_v26, 111 }
   0xf   : > { %s246_s30 = scalar_lea.vmem %s971_s0, %s746_s27  ;;  %s251_s26 = scalar_lea.vmem %s977_s6, %s746_s27 }
  0x10   : > { %v253_v4 = vld [vmem:[%s246_s30 + $0x8] sm:$0xff]  ;;  %v252_v5 = vld [vmem:[%s246_s30] sm:$0xff] }
  0x11   : > { %275 = vmatprep.subr.mxu0 %v253_v4 }
  0x12   : > { %276 = vmatpush1.msra.mxu0 %v252_v5 }
  0x13   : > { %733 = vmatmul.mubr.msk.f32.vlgmr.msra.gmra.mrb[0].mxu0 %vm268_vm0, %v254_v6 }
  0x14   : > { %345 = vmatprep.mubr.f32.mxu0 %v802_v0 }
  0x17   : > { %734 = vmatmul.mubr.msk.f32.gmra.mrb[2].mxu0 %vm268_vm0, %v255_v7 }
  0x18   : > { %652 = vmatprep.mubr.f32.mxu0 %v802_v0  ;;  %v470_v0 = vrot.slane %v738_v57, %v908_v29 }
  0x86   : > { %v261_v8 = vpop.permute.xlu0 %260 }
  0x8a   : > { %v266_v11 = vpop.permute.xlu0 %265 }
  0xe6   : > { %v341_v9 = vpop.f32.mrb[0].mxu0 }
  0xe7   : > { %v343_v10 = vpop.f32.mrb[1].mxu0  ;;  %v342_v13 = vadd.f32 %v341_v9, %v261_v8 }
  0xe8   : > { %v344_v16 = vadd.f32 %v343_v10, %v261_v8 }
  0xea   : > { %v347_v12 = vpop.f32.mrb[2].mxu0 }
  0xeb   : > { %v348_v14 = vadd.f32 %v347_v12, %v266_v11  ;;  %v349_v15 = vpop.f32.mrb[3].mxu0 }
  0xec   : > { %v350_v17 = vadd.f32 %v349_v15, %v266_v11 }
  0xed   : > { %v875_v18 = vmax.f32 %v342_v13, %v348_v14  ;;  %v739_v13 = vld [vmem:[%s972_s1 + $0xc] sm:$0x3]  ;;  %v740_v14 = vld [vmem:[%s972_s1 + $0xe] sm:$0x3] }
  0xee   : > { %v877_v19 = vmax.f32 %v344_v16, %v350_v17  ;;  %v494_v22 = vrot.slane %v739_v13, %v908_v29  ;;  %v514_v23 = vrot.slane %v740_v14, %v903_v27 }
  0xef   : > { %379 = vrot.lane.b32.xlu0 %v875_v18, %s804_s11  ;;  %354 = vrot.lane.b32.xlu1 %v875_v18, %s805_s12 }
  0xf3   : > { %403 = vrot.lane.b32.xlu0 %v875_v18, %s806_s13  ;;  %356 = vrot.lane.b32.xlu1 %v877_v19, %s805_s12 }
  0xf7   : > { %427 = vrot.lane.b32.xlu0 %v875_v18, %s807_s14  ;;  %381 = vrot.lane.b32.xlu1 %v877_v19, %s804_s11 }
  0xfb   : > { %453 = vrot.lane.b32.xlu0 %v875_v18, %s808_s15  ;;  %405 = vrot.lane.b32.xlu1 %v877_v19, %s806_s13 }
  0xff   : > { %477 = vrot.lane.b32.xlu0 %v875_v18, %s809_s16  ;;  %429 = vrot.lane.b32.xlu1 %v877_v19, %s807_s14 }
 0x103   : > { %501 = vrot.lane.b32.xlu0 %v875_v18, %s810_s17  ;;  %455 = vrot.lane.b32.xlu1 %v877_v19, %s808_s15 }
 0x107   : > { %525 = vrot.lane.b32.xlu0 %v875_v18, %s811_s18  ;;  %479 = vrot.lane.b32.xlu1 %v877_v19, %s809_s16 }
 0x10b   : > { %573 = vperm.xlu0 %792, %v569_v20   ;;  %503 = vrot.lane.b32.xlu1 %v877_v19, %s810_s17  ;;  %v490_v20 = vrot.slane %v739_v13, %v903_v27 }
 0x10f   : > { %527 = vrot.lane.b32.xlu1 %v877_v19, %s811_s18 }
 0x113   : > { %578 = vperm.xlu1 %793, %v570_v21  }
 0x161   : > { %v380_v24 = vpop.permute.xlu0 %379  ;;  %v355_v25 = vpop.permute.xlu1 %354 }
 0x165   : > { %v404_v31 = vpop.permute.xlu0 %403  ;;  %v357_v32 = vpop.permute.xlu1 %356 }
 0x166   : > { %v361_v37 = vsel %vm360_vm1, %v355_v25, %v357_v32  ;;  %v362_v38 = vsel %vm360_vm1, %v357_v32, %v355_v25 }
 0x167   : > { %v375_v43 = vmul.f32 %v368_v33, %v362_v38  ;;  %v376_v44 = vmul.f32 %v372_v34, %v361_v37 }
 0x169   : > { %v428_v39 = vpop.permute.xlu0 %427  ;;  %v382_v40 = vpop.permute.xlu1 %381 }
 0x16a   : > { %v384_v41 = vsel %vm383_vm2, %v380_v24, %v382_v40  ;;  %v385_v42 = vsel %vm383_vm2, %v382_v40, %v380_v24  ;;  %v518_v24 = vrot.slane %v740_v14, %v908_v29 }
 0x16b   : > { %v399_v45 = vmul.f32 %v392_v35, %v385_v42  ;;  %v400_v46 = vmul.f32 %v396_v36, %v384_v41 }
 0x16d   : > { %v750_v49 = vpack.c.bf16 %v399_v45, %v375_v43  ;;  %v406_v50 = vpop.permute.xlu1 %405  ;;  %v748_v51 = vpack.c.bf16 %v400_v46, %v376_v44  ;;  %v454_v53 = vpop.permute.xlu0 %453 }
 0x16e   : > { %v408_v58 = vsel %vm407_vm3, %v404_v31, %v406_v50  ;;  %v409_v59 = vsel %vm407_vm3, %v406_v50, %v404_v31 }
 0x16f   : > { %749 = vmatprep.subr.bf16.mxu0 %v748_v51  ;;  %764 = vmatprep.subr.bf16.mxu1 %v748_v51  ;;  %v423_v1 = vmul.f32 %v416_v52, %v409_v59  ;;  %v424_v2 = vmul.f32 %v420_v54, %v408_v58 }
 0x170   : > { %751 = vmatpush1.bf16.msra.mxu0 %v750_v49  ;;  %769 = vmatpush1.bf16.msra.mxu1 %v750_v49 }
 0x171   : > { %v430_v60 = vpop.permute.xlu1 %429  ;;  %v478_v5 = vpop.permute.xlu0 %477 }
 0x172   : > { %v432_v61 = vsel %vm431_vm4, %v428_v39, %v430_v60  ;;  %v433_v62 = vsel %vm431_vm4, %v430_v60, %v428_v39 }
 0x173   : > { %v447_v3 = vmul.f32 %v440_v55, %v433_v62  ;;  %v448_v4 = vmul.f32 %v444_v56, %v432_v61 }
 0x175   : > { %v754_v6 = vpack.c.bf16 %v447_v3, %v423_v1  ;;  %v456_v7 = vpop.permute.xlu1 %455  ;;  %v752_v8 = vpack.c.bf16 %v448_v4, %v424_v2  ;;  %v502_v21 = vpop.permute.xlu0 %501 }
 0x176   : > { %v458_v9 = vsel %vm457_vm5, %v454_v53, %v456_v7  ;;  %v459_v10 = vsel %vm457_vm5, %v456_v7, %v454_v53 }
 0x177   : > { %v473_v11 = vmul.f32 %v466_v63, %v458_v9  ;;  %v474_v12 = vmul.f32 %v470_v0, %v459_v10  ;;  %753 = vmatprep.subr.bf16.mxu0 %v752_v8  ;;  %765 = vmatprep.subr.bf16.mxu1 %v752_v8 }
 0x178   : > { %755 = vmatpush1.bf16.msra.mxu0 %v754_v6  ;;  %770 = vmatpush1.bf16.msra.mxu1 %v754_v6 }
 0x179   : > { %v758_v15 = vpack.c.bf16 %v473_v11, %v875_v18  ;;  %v480_v16 = vpop.permute.xlu1 %479  ;;  %v756_v17 = vpack.c.bf16 %v474_v12, %v877_v19  ;;  %v741_v18 = vld [vmem:[%s972_s1 + $0x10] sm:$0x3]  ;;  %v526_v37 = vpop.permute.xlu0 %525 }
 0x17a   : > { %v482_v25 = vsel %vm481_vm6, %v478_v5, %v480_v16  ;;  %v483_v28 = vsel %vm481_vm6, %v480_v16, %v478_v5  ;;  %v542_v32 = vrot.slane %v741_v18, %v908_v29  ;;  %v538_v41 = vrot.slane %v741_v18, %v903_v27  ;;  %v549_v29 = vld [vmem:[%s975_s4] sm:$0xff]  ;;  %v550_v27 = vld [vmem:[%s975_s4 + $0x8] sm:$0xff] }
 0x17b   : > { %757 = vmatprep.subr.bf16.mxu0 %v756_v17  ;;  %766 = vmatprep.subr.bf16.mxu1 %v756_v17  ;;  %v497_v33 = vmul.f32 %v490_v20, %v482_v25  ;;  %v498_v34 = vmul.f32 %v494_v22, %v483_v28 }
 0x17c   : > { %759 = vmatpush1.bf16.msra.mxu0 %v758_v15  ;;  %771 = vmatpush1.bf16.msra.mxu1 %v758_v15 }
 0x17d   : > { %v504_v19 = vpop.permute.xlu1 %503 }
 0x17e   : > { %v506_v30 = vsel %vm505_vm7, %v502_v21, %v504_v19  ;;  %v507_v31 = vsel %vm505_vm7, %v504_v19, %v502_v21 }
 0x17f   : > { %v521_v35 = vmul.f32 %v514_v23, %v506_v30  ;;  %v522_v36 = vmul.f32 %v518_v24, %v507_v31 }
 0x181   : > { %v762_v38 = vpack.c.bf16 %v521_v35, %v497_v33  ;;  %v528_v39 = vpop.permute.xlu1 %527  ;;  %v760_v40 = vpack.c.bf16 %v522_v36, %v498_v34 }
 0x182   : > { %v531_v42 = vsel %vm529_vm8, %v528_v39, %v526_v37  ;;  %v530_v43 = vsel %vm529_vm8, %v526_v37, %v528_v39 }
 0x183   : > { %v546_v44 = vmul.f32 %v542_v32, %v531_v42  ;;  %761 = vmatprep.subr.bf16.mxu0 %v760_v40  ;;  %767 = vmatprep.subr.bf16.mxu1 %v760_v40  ;;  %v545_v26 = vmul.f32 %v538_v41, %v530_v43 }
 0x184   : > { %763 = vmatpush1.bf16.msra.mxu0 %v762_v38  ;;  %772 = vmatpush1.bf16.msra.mxu1 %v762_v38 }
 0x185   : > { %604 = vmatprep.subr.mxu0 %v546_v44  ;;  %768 = vmatprep.subr.mxu1 %v546_v44 }
 0x188   : > { %605 = vmatpush1.msra.mxu0 %v545_v26  ;;  %773 = vmatpush1.msra.mxu1 %v545_v26 }
 0x189   : > { %742 = vmatmul.mubr.msk.f32.vlgmr.msra.gmra.mrb[4].mxu0 %vm581_vm9, %v549_v29  ;;  %743 = vmatmul.mubr.msk.f32.vlgmr.msra.gmra.mrb[0].mxu1 %vm581_vm9, %v550_v27 }
 0x18a   : > { %v574_v46 = vpop.permute.xlu0 %573 }
 0x192   : > { %v579_v45 = vpop.permute.xlu1 %578 }
 0x25c   : > { %v654_v47 = vpop.f32.mrb[4].mxu0  ;;  %v660_v48 = vpop.f32.mrb[0].mxu1 }
 0x25d   : > { %v655_v49 = vadd.f32 %v654_v47, %v574_v46  ;;  %v661_v50 = vadd.f32 %v660_v48, %v579_v45  ;;  %v656_v51 = vpop.f32.mrb[5].mxu0  ;;  %v662_v52 = vpop.f32.mrb[1].mxu1 }
 0x25e   : > { %v657_v53 = vadd.f32 %v656_v51, %v574_v46  ;;  %v663_v54 = vadd.f32 %v662_v52, %v579_v45 }
 0x25f   : > { %v665_v55 = vmax.f32 %v655_v49, %v661_v50 }
 0x260   : > { %v666_v56 = vmax.f32 %v657_v53, %v663_v54 }
 0x261   : > { %667 = vst [vmem:[%s251_s26] sm:$0xff] %v665_v55 }
 0x262   : > { %668 = vst [vmem:[%s251_s26 + $0x8] sm:$0xff] %v666_v56 }
 0x263 PF: > { %s16_s21 = sadd.s32 1, %s800_s21  }
 0x264   : > { %p13_p4 = scmp.ge.s32.totalorder %s16_s21, 4  }
 0x266   :  { %15 = sbr.rel (!%p13_p4) target bundleno = 1 (0x1), region = 81 }

</bundles_post_ra>
